<compile_context>
chip_gen: v7x
topology: tpu7x:2x2x1
jax: 0.10.0
libtpu: 0.0.40
codegen_flags: <defaults>
</compile_context>

<pallas_src>
import functools

import jax
import jax.numpy as jnp
from jax.experimental import pallas as pl
from jax.experimental.pallas import tpu as pltpu


def _round_up(a, b):
    return (a + b - 1) // b * b


def _l2n(v, eps):
    return v / jnp.maximum(jnp.sqrt(jnp.sum(v * v, axis=0, keepdims=True)), eps)


def _power_iter_sigma(weight, weight_u, n_iter, eps):
    """Torch-style spectral-norm power iteration (detached, tiny mat-vecs)."""
    cout = weight.shape[0]
    w_flat = jax.lax.stop_gradient(weight.reshape(cout, -1).astype(jnp.float32))
    u = jax.lax.stop_gradient(weight_u.astype(jnp.float32))
    v = None
    for _ in range(n_iter):
        v = _l2n(w_flat.T @ u, eps)          # (Cin*K*K, 1)
        u = _l2n(w_flat @ v, eps)            # (Cout, 1)
    sigma = (u.T @ w_flat @ v)[0, 0]
    return sigma, u


def _dconv_kernel(w_ref, b_ref, y_ref, o_ref, *, kt, wp2):
    """One image per grid step.

    w_ref: (Kt*Kt, Cout_pad, C2_pad) bf16  resident, already divided by sigma
    b_ref: (Cout_pad, 1)             f32   resident bias
    y_ref: (C2_pad, S_pad)           bf16  phase-split, spatially-flattened image
    o_ref: (Cout_pad, L_pad)         f32   flattened output rows (lane-dense)
    """
    cout_p, l_pad = o_ref.shape
    acc = jnp.zeros((cout_p, l_pad), jnp.float32)
    for a in range(kt):
        for b in range(kt):
            off = a * wp2 + b                        # static python int
            tap = w_ref[a * kt + b]                  # (Cout_pad, C2_pad)
            win = y_ref[:, off:off + l_pad]          # contiguous (C2_pad, L_pad)
            acc = acc + jnp.dot(tap, win, preferred_element_type=jnp.float32)
    acc = acc + b_ref[...]                           # bias broadcast over lanes
    # LeakyReLU(0.2); f32 epilogue (v5e has no bf16 VPU), free under the DMA.
    o_ref[...] = jnp.where(acc >= 0.0, acc, 0.2 * acc)


@functools.partial(jax.jit, static_argnames=("stride", "padding", "n_iter"))
def dconv_forward(x, weight, bias, weight_u, *, stride=2, padding=2,
                  n_iter=1, eps=1e-12):
    """x: (N, Cin, H, W) f32.  Returns (out (N, Cout, OH, OW) f32, updated u)."""
    if n_iter < 1:
        raise ValueError("n_iter must be >= 1 (matches the torch module).")
    N, Cin, H, W = x.shape
    Cout, _, K, _ = weight.shape
    s, p = stride, padding
    OH = (H + 2 * p - K) // s + 1
    OW = (W + 2 * p - K) // s + 1
    Kt = -(-K // s)                       # taps per dim after phase split
    C2 = s * s * Cin                      # phase-split channel count

    # ---- spectral norm (parameter-setup glue; torch does it under no_grad) ----
    sigma, u_new = _power_iter_sigma(weight, weight_u, n_iter, eps)

    # ---- weight re-arrangement: stride-s KxK -> stride-1 Kt x Kt over C2 ------
    # TODO(synk): conv runs with bf16 operands / f32 accumulation (perf choice);
    # torch uses full f32 — switch dtypes here if the consumer needs that.
    Kp = Kt * s
    w_sn = weight.astype(jnp.float32) / sigma          # torch: weight.data.div_(sigma)
    w2 = jnp.pad(w_sn, ((0, 0), (0, 0), (0, Kp - K), (0, Kp - K)))
    w2 = w2.reshape(Cout, Cin, Kt, s, Kt, s).transpose(2, 4, 0, 3, 5, 1)
    w2 = w2.reshape(Kt * Kt, Cout, C2)                  # channel order = (p, q, c)

    Cout_pad = _round_up(Cout, 8)          # f32 sublane granularity (was 16)
    C2_pad = _round_up(C2, 8)
    w2 = jnp.pad(w2, ((0, 0), (0, Cout_pad - Cout), (0, C2_pad - C2)))
    w2 = w2.astype(jnp.bfloat16)
    b_col = jnp.pad(bias.astype(jnp.float32), (0, Cout_pad - Cout))
    b_col = b_col.reshape(Cout_pad, 1)

    # ---- fused-im2col input prep: bf16 -> pad -> phase split -> flatten -------
    Hp = _round_up(H + 2 * p, s)
    Wp = _round_up(W + 2 * p, s)
    Hp2, Wp2 = Hp // s, Wp // s
    xp = jnp.pad(x.astype(jnp.bfloat16),               # cast before all plumbing
                 ((0, 0), (0, 0), (p, Hp - H - p), (p, Wp - W - p)))
    y = xp.reshape(N, Cin, Hp2, s, Wp2, s).transpose(0, 3, 5, 1, 2, 4)
    y = y.reshape(N, C2, Hp2 * Wp2)                     # (N, C2, S) bf16

    L = OH * Wp2                                        # valid flattened out cols
    L_pad = _round_up(L, 128)                           # lane-dense stores
    off_max = (Kt - 1) * Wp2 + (Kt - 1)
    S_pad = _round_up(max(Hp2 * Wp2, off_max + L_pad), 128)
    y = jnp.pad(y, ((0, 0), (0, C2_pad - C2), (0, S_pad - Hp2 * Wp2)))

    kernel = functools.partial(_dconv_kernel, kt=Kt, wp2=Wp2)
    flops = 2 * N * Kt * Kt * Cout_pad * C2_pad * L_pad
    bytes_acc = (N * C2_pad * S_pad * 2 + N * Cout_pad * L_pad * 4
                 + Kt * Kt * Cout_pad * C2_pad * 2 + Cout_pad * 4)

    out = pl.pallas_call(
        kernel,
        out_shape=jax.ShapeDtypeStruct((N, Cout_pad, L_pad), jnp.float32),
        grid=(N,),
        in_specs=[
            # resident re-arranged weight and bias (same block every step)
            pl.BlockSpec((Kt * Kt, Cout_pad, C2_pad), lambda n: (0, 0, 0)),
            pl.BlockSpec((Cout_pad, 1), lambda n: (0, 0)),
            # one image's phase-split slab per step (double-buffered by Pallas)
            pl.BlockSpec((None, C2_pad, S_pad), lambda n: (n, 0, 0)),
        ],
        out_specs=pl.BlockSpec((None, Cout_pad, L_pad), lambda n: (n, 0, 0)),
        compiler_params=pltpu.CompilerParams(
            dimension_semantics=("parallel",)),      # shard batch across v7x TCs
        cost_estimate=pl.CostEstimate(flops=flops, transcendentals=0,
                                      bytes_accessed=bytes_acc),
    )(w2, b_col, y)

    # drop padding; output already in (N, Cout, ...) order — no transpose pass
    out = out[:, :Cout, :L].reshape(N, Cout, OH, Wp2)[:, :, :, :OW]
    return out, u_new


if __name__ == "__main__":
    # Small shapes consistent with DConv(cnum_in=4, cnum_out=8, ksize=5, stride=2)
    N, Cin, H, W = 2, 4, 16, 16
    Cout, K = 8, 5
    stride, padding = 2, (K - 1) // 2

    key = jax.random.PRNGKey(0)
    kx, kw, kb, ku = jax.random.split(key, 4)
    x = jax.random.normal(kx, (N, Cin, H, W), dtype=jnp.float32)
    weight = jax.random.normal(kw, (Cout, Cin, K, K), dtype=jnp.float32) * 0.1
    bias = jax.random.normal(kb, (Cout,), dtype=jnp.float32) * 0.1
    weight_u = jax.random.truncated_normal(ku, -2.0, 2.0, (Cout, 1),
                                           dtype=jnp.float32)

    y, u_new = dconv_forward(x, weight, bias, weight_u,
                             stride=stride, padding=padding)
    y = jax.block_until_ready(y)

    # --- reference: same spectral norm, bf16-operand conv (f32 accum), leaky ---
    sigma_ref, _ = _power_iter_sigma(weight, weight_u, 1, 1e-12)
    w_sn_ref = (weight / sigma_ref).astype(jnp.bfloat16)
    ref = jax.lax.conv_general_dilated(
        x.astype(jnp.bfloat16), w_sn_ref,
        window_strides=(stride, stride),
        padding=((padding, padding), (padding, padding)),
        dimension_numbers=("NCHW", "OIHW", "NCHW"),
        preferred_element_type=jnp.float32)
    ref = ref + bias[None, :, None, None]
    ref = jnp.where(ref >= 0.0, ref, 0.2 * ref)

    assert y.shape == (N, Cout, H // stride, W // stride), y.shape
    assert u_new.shape == (Cout, 1), u_new.shape
    err = float(jnp.max(jnp.abs(y - ref)))
    assert jnp.allclose(y, ref, rtol=2e-3, atol=2e-3), err

    print("KERNEL_OK")
</pallas_src>

<mosaic_0001>
module attributes {stable_mosaic.version = 11 : i64} {
  func.func @_dconv_kernel(%arg0: i32, %arg1: memref<9x8x16xbf16, #tpu.memory_space<vmem>>, %arg2: memref<8x1xf32, #tpu.memory_space<vmem>>, %arg3: memref<1x16x256xbf16, #tpu.memory_space<vmem>>, %arg4: memref<1x8x128xf32, #tpu.memory_space<vmem>>) attributes {dimension_semantics = [#tpu.dimension_semantics<parallel>], iteration_bounds = array<i64: 2>, scalar_prefetch = 0 : i64, scratch_operands = 0 : i64, tpu.core_type = #tpu.core_type<tc>, window_params = [{pipeline_mode = #tpu.pipeline_mode<synchronous>, transform_indices = @transform_0, window_bounds = array<i64: 9, 8, 16>}, {pipeline_mode = #tpu.pipeline_mode<synchronous>, transform_indices = @transform_1, window_bounds = array<i64: 8, 1>}, {transform_indices = @transform_2, window_bounds = array<i64: 1, 16, 256>}, {transform_indices = @transform_3, window_bounds = array<i64: 1, 8, 128>}]} {
    %cst = arith.constant 0.000000e+00 : f32
    %0 = vector.broadcast %cst : f32 to vector<8x128xf32>
    %c0 = arith.constant 0 : index
    %c0_0 = arith.constant 0 : index
    %c0_1 = arith.constant 0 : index
    %1 = vector.load %arg1[%c0, %c0_0, %c0_1] : memref<9x8x16xbf16, #tpu.memory_space<vmem>>, vector<1x8x16xbf16>
    %2 = vector.shape_cast %1 : vector<1x8x16xbf16> to vector<8x16xbf16>
    %c0_2 = arith.constant 0 : index
    %c0_3 = arith.constant 0 : index
    %c0_4 = arith.constant 0 : index
    %3 = vector.load %arg3[%c0_2, %c0_3, %c0_4] : memref<1x16x256xbf16, #tpu.memory_space<vmem>>, vector<1x16x128xbf16>
    %4 = vector.shape_cast %3 : vector<1x16x128xbf16> to vector<16x128xbf16>
    %cst_5 = arith.constant dense<0.000000e+00> : vector<8x128xf32>
    %5 = tpu.matmul %2, %4, %cst_5 {dimension_numbers = #tpu.dot_dimension_numbers<[1], [0], [0], [1], [0, 0, 1, 1], [], []>} : vector<8x16xbf16>, vector<16x128xbf16>, vector<8x128xf32> -> vector<8x128xf32>
    %6 = arith.addf %0, %5 : vector<8x128xf32>
    %c1 = arith.constant 1 : index
    %c0_6 = arith.constant 0 : index
    %c0_7 = arith.constant 0 : index
    %7 = vector.load %arg1[%c1, %c0_6, %c0_7] : memref<9x8x16xbf16, #tpu.memory_space<vmem>>, vector<1x8x16xbf16>
    %8 = vector.shape_cast %7 : vector<1x8x16xbf16> to vector<8x16xbf16>
    %c0_8 = arith.constant 0 : index
    %c0_9 = arith.constant 0 : index
    %c1_10 = arith.constant 1 : index
    %9 = vector.load %arg3[%c0_8, %c0_9, %c1_10] : memref<1x16x256xbf16, #tpu.memory_space<vmem>>, vector<1x16x128xbf16>
    %10 = vector.shape_cast %9 : vector<1x16x128xbf16> to vector<16x128xbf16>
    %cst_11 = arith.constant dense<0.000000e+00> : vector<8x128xf32>
    %11 = tpu.matmul %8, %10, %cst_11 {dimension_numbers = #tpu.dot_dimension_numbers<[1], [0], [0], [1], [0, 0, 1, 1], [], []>} : vector<8x16xbf16>, vector<16x128xbf16>, vector<8x128xf32> -> vector<8x128xf32>
    %12 = arith.addf %6, %11 : vector<8x128xf32>
    %c2 = arith.constant 2 : index
    %c0_12 = arith.constant 0 : index
    %c0_13 = arith.constant 0 : index
    %13 = vector.load %arg1[%c2, %c0_12, %c0_13] : memref<9x8x16xbf16, #tpu.memory_space<vmem>>, vector<1x8x16xbf16>
    %14 = vector.shape_cast %13 : vector<1x8x16xbf16> to vector<8x16xbf16>
    %c0_14 = arith.constant 0 : index
    %c0_15 = arith.constant 0 : index
    %c2_16 = arith.constant 2 : index
    %15 = vector.load %arg3[%c0_14, %c0_15, %c2_16] : memref<1x16x256xbf16, #tpu.memory_space<vmem>>, vector<1x16x128xbf16>
    %16 = vector.shape_cast %15 : vector<1x16x128xbf16> to vector<16x128xbf16>
    %cst_17 = arith.constant dense<0.000000e+00> : vector<8x128xf32>
    %17 = tpu.matmul %14, %16, %cst_17 {dimension_numbers = #tpu.dot_dimension_numbers<[1], [0], [0], [1], [0, 0, 1, 1], [], []>} : vector<8x16xbf16>, vector<16x128xbf16>, vector<8x128xf32> -> vector<8x128xf32>
    %18 = arith.addf %12, %17 : vector<8x128xf32>
    %c3 = arith.constant 3 : index
    %c0_18 = arith.constant 0 : index
    %c0_19 = arith.constant 0 : index
    %19 = vector.load %arg1[%c3, %c0_18, %c0_19] : memref<9x8x16xbf16, #tpu.memory_space<vmem>>, vector<1x8x16xbf16>
    %20 = vector.shape_cast %19 : vector<1x8x16xbf16> to vector<8x16xbf16>
    %c0_20 = arith.constant 0 : index
    %c0_21 = arith.constant 0 : index
    %c10 = arith.constant 10 : index
    %21 = vector.load %arg3[%c0_20, %c0_21, %c10] : memref<1x16x256xbf16, #tpu.memory_space<vmem>>, vector<1x16x128xbf16>
    %22 = vector.shape_cast %21 : vector<1x16x128xbf16> to vector<16x128xbf16>
    %cst_22 = arith.constant dense<0.000000e+00> : vector<8x128xf32>
    %23 = tpu.matmul %20, %22, %cst_22 {dimension_numbers = #tpu.dot_dimension_numbers<[1], [0], [0], [1], [0, 0, 1, 1], [], []>} : vector<8x16xbf16>, vector<16x128xbf16>, vector<8x128xf32> -> vector<8x128xf32>
    %24 = arith.addf %18, %23 : vector<8x128xf32>
    %c4 = arith.constant 4 : index
    %c0_23 = arith.constant 0 : index
    %c0_24 = arith.constant 0 : index
    %25 = vector.load %arg1[%c4, %c0_23, %c0_24] : memref<9x8x16xbf16, #tpu.memory_space<vmem>>, vector<1x8x16xbf16>
    %26 = vector.shape_cast %25 : vector<1x8x16xbf16> to vector<8x16xbf16>
    %c0_25 = arith.constant 0 : index
    %c0_26 = arith.constant 0 : index
    %c11 = arith.constant 11 : index
    %27 = vector.load %arg3[%c0_25, %c0_26, %c11] : memref<1x16x256xbf16, #tpu.memory_space<vmem>>, vector<1x16x128xbf16>
    %28 = vector.shape_cast %27 : vector<1x16x128xbf16> to vector<16x128xbf16>
    %cst_27 = arith.constant dense<0.000000e+00> : vector<8x128xf32>
    %29 = tpu.matmul %26, %28, %cst_27 {dimension_numbers = #tpu.dot_dimension_numbers<[1], [0], [0], [1], [0, 0, 1, 1], [], []>} : vector<8x16xbf16>, vector<16x128xbf16>, vector<8x128xf32> -> vector<8x128xf32>
    %30 = arith.addf %24, %29 : vector<8x128xf32>
    %c5 = arith.constant 5 : index
    %c0_28 = arith.constant 0 : index
    %c0_29 = arith.constant 0 : index
    %31 = vector.load %arg1[%c5, %c0_28, %c0_29] : memref<9x8x16xbf16, #tpu.memory_space<vmem>>, vector<1x8x16xbf16>
    %32 = vector.shape_cast %31 : vector<1x8x16xbf16> to vector<8x16xbf16>
    %c0_30 = arith.constant 0 : index
    %c0_31 = arith.constant 0 : index
    %c12 = arith.constant 12 : index
    %33 = vector.load %arg3[%c0_30, %c0_31, %c12] : memref<1x16x256xbf16, #tpu.memory_space<vmem>>, vector<1x16x128xbf16>
    %34 = vector.shape_cast %33 : vector<1x16x128xbf16> to vector<16x128xbf16>
    %cst_32 = arith.constant dense<0.000000e+00> : vector<8x128xf32>
    %35 = tpu.matmul %32, %34, %cst_32 {dimension_numbers = #tpu.dot_dimension_numbers<[1], [0], [0], [1], [0, 0, 1, 1], [], []>} : vector<8x16xbf16>, vector<16x128xbf16>, vector<8x128xf32> -> vector<8x128xf32>
    %36 = arith.addf %30, %35 : vector<8x128xf32>
    %c6 = arith.constant 6 : index
    %c0_33 = arith.constant 0 : index
    %c0_34 = arith.constant 0 : index
    %37 = vector.load %arg1[%c6, %c0_33, %c0_34] : memref<9x8x16xbf16, #tpu.memory_space<vmem>>, vector<1x8x16xbf16>
    %38 = vector.shape_cast %37 : vector<1x8x16xbf16> to vector<8x16xbf16>
    %c0_35 = arith.constant 0 : index
    %c0_36 = arith.constant 0 : index
    %c20 = arith.constant 20 : index
    %39 = vector.load %arg3[%c0_35, %c0_36, %c20] : memref<1x16x256xbf16, #tpu.memory_space<vmem>>, vector<1x16x128xbf16>
    %40 = vector.shape_cast %39 : vector<1x16x128xbf16> to vector<16x128xbf16>
    %cst_37 = arith.constant dense<0.000000e+00> : vector<8x128xf32>
    %41 = tpu.matmul %38, %40, %cst_37 {dimension_numbers = #tpu.dot_dimension_numbers<[1], [0], [0], [1], [0, 0, 1, 1], [], []>} : vector<8x16xbf16>, vector<16x128xbf16>, vector<8x128xf32> -> vector<8x128xf32>
    %42 = arith.addf %36, %41 : vector<8x128xf32>
    %c7 = arith.constant 7 : index
    %c0_38 = arith.constant 0 : index
    %c0_39 = arith.constant 0 : index
    %43 = vector.load %arg1[%c7, %c0_38, %c0_39] : memref<9x8x16xbf16, #tpu.memory_space<vmem>>, vector<1x8x16xbf16>
    %44 = vector.shape_cast %43 : vector<1x8x16xbf16> to vector<8x16xbf16>
    %c0_40 = arith.constant 0 : index
    %c0_41 = arith.constant 0 : index
    %c21 = arith.constant 21 : index
    %45 = vector.load %arg3[%c0_40, %c0_41, %c21] : memref<1x16x256xbf16, #tpu.memory_space<vmem>>, vector<1x16x128xbf16>
    %46 = vector.shape_cast %45 : vector<1x16x128xbf16> to vector<16x128xbf16>
    %cst_42 = arith.constant dense<0.000000e+00> : vector<8x128xf32>
    %47 = tpu.matmul %44, %46, %cst_42 {dimension_numbers = #tpu.dot_dimension_numbers<[1], [0], [0], [1], [0, 0, 1, 1], [], []>} : vector<8x16xbf16>, vector<16x128xbf16>, vector<8x128xf32> -> vector<8x128xf32>
    %48 = arith.addf %42, %47 : vector<8x128xf32>
    %c8 = arith.constant 8 : index
    %c0_43 = arith.constant 0 : index
    %c0_44 = arith.constant 0 : index
    %49 = vector.load %arg1[%c8, %c0_43, %c0_44] : memref<9x8x16xbf16, #tpu.memory_space<vmem>>, vector<1x8x16xbf16>
    %50 = vector.shape_cast %49 : vector<1x8x16xbf16> to vector<8x16xbf16>
    %c0_45 = arith.constant 0 : index
    %c0_46 = arith.constant 0 : index
    %c22 = arith.constant 22 : index
    %51 = vector.load %arg3[%c0_45, %c0_46, %c22] : memref<1x16x256xbf16, #tpu.memory_space<vmem>>, vector<1x16x128xbf16>
    %52 = vector.shape_cast %51 : vector<1x16x128xbf16> to vector<16x128xbf16>
    %cst_47 = arith.constant dense<0.000000e+00> : vector<8x128xf32>
    %53 = tpu.matmul %50, %52, %cst_47 {dimension_numbers = #tpu.dot_dimension_numbers<[1], [0], [0], [1], [0, 0, 1, 1], [], []>} : vector<8x16xbf16>, vector<16x128xbf16>, vector<8x128xf32> -> vector<8x128xf32>
    %54 = arith.addf %48, %53 : vector<8x128xf32>
    %c0_48 = arith.constant 0 : index
    %c0_49 = arith.constant 0 : index
    %55 = vector.load %arg2[%c0_48, %c0_49] : memref<8x1xf32, #tpu.memory_space<vmem>>, vector<8x1xf32>
    %56 = vector.broadcast %55 : vector<8x1xf32> to vector<8x128xf32>
    %57 = arith.addf %54, %56 : vector<8x128xf32>
    %cst_50 = arith.constant 0.000000e+00 : f32
    %58 = vector.broadcast %cst_50 : f32 to vector<8x128xf32>
    %59 = arith.cmpf oge, %57, %58 : vector<8x128xf32>
    %cst_51 = arith.constant 2.000000e-01 : f32
    %60 = vector.broadcast %cst_51 : f32 to vector<8x128xf32>
    %61 = arith.mulf %60, %57 : vector<8x128xf32>
    %62 = arith.select %59, %57, %61 : vector<8x128xi1>, vector<8x128xf32>
    %c0_52 = arith.constant 0 : index
    %c0_53 = arith.constant 0 : index
    %c0_54 = arith.constant 0 : index
    %63 = vector.load %arg4[%c0_52, %c0_53, %c0_54] : memref<1x8x128xf32, #tpu.memory_space<vmem>>, vector<1x8x128xf32>
    %64 = vector.shape_cast %63 : vector<1x8x128xf32> to vector<8x128xf32>
    %65 = vector.shape_cast %62 : vector<8x128xf32> to vector<1x8x128xf32>
    tpu.vector_store %arg4[%c0_52, %c0_53, %c0_54], %65 {strides = array<i32>} : memref<1x8x128xf32, #tpu.memory_space<vmem>>, vector<1x8x128xf32>,
    return
  }
  func.func @transform_0(%arg0: i32) -> (i32, i32, i32) {
    %c0_i32 = arith.constant 0 : i32
    %c0_i32_0 = arith.constant 0 : i32
    %c0_i32_1 = arith.constant 0 : i32
    %c0_i32_2 = arith.constant 0 : i32
    return %c0_i32, %c0_i32_0, %c0_i32_1 : i32, i32, i32
  }
  func.func @transform_1(%arg0: i32) -> (i32, i32) {
    %c0_i32 = arith.constant 0 : i32
    %c0_i32_0 = arith.constant 0 : i32
    %c0_i32_1 = arith.constant 0 : i32
    return %c0_i32, %c0_i32_0 : i32, i32
  }
  func.func @transform_2(%arg0: i32) -> (i32, i32, i32) {
    %c0_i32 = arith.constant 0 : i32
    %c0_i32_0 = arith.constant 0 : i32
    %c0_i32_1 = arith.constant 0 : i32
    return %arg0, %c0_i32, %c0_i32_0 : i32, i32, i32
  }
  func.func @transform_3(%arg0: i32) -> (i32, i32, i32) {
    %c0_i32 = arith.constant 0 : i32
    %c0_i32_0 = arith.constant 0 : i32
    %c0_i32_1 = arith.constant 0 : i32
    return %arg0, %c0_i32, %c0_i32_0 : i32, i32, i32
  }
}

</mosaic_0001>

<bundles_post_ra>
// kernel: dconv_forward.1
= control target key start
LH: loop header
LB: loop body
LE: loop exit
PB: predicated region body
PF: predicated region fallthrough
CT: control target
= control target key end

     0   :  { %s886_s12 = smov 0   ;;  %s973_s0 = inlined_call_operand.vmem [shape: bf16[9,8,16], index: 0, kind: input, shape index: {}]   ;;  %s974_s1 = inlined_call_operand.vmem [shape: f32[8,1], index: 1, kind: input, shape index: {}]   ;;  %s975_s2 = inlined_call_operand.vmem [shape: bf16[2,16,256], index: 2, kind: input, shape index: {}]   ;;  %s976_s3 = inlined_call_operand.vmem [shape: f32[2,8,128], index: 3, kind: output, shape index: {}]  }
   0x1 LB: > { %s720_s13 = sadd.s32 4294967295, %s853_s12   ;;  %p724_p0 = scmp.ge.s32.totalorder %s853_s12, 1  ;;  %s853_s12 = sphi %s886_s12, %s13_s12  }
   0x2   : > { %p137_p1 = scmp.lt.s32.totalorder %s853_s12, 3 }
   0x4   : > { %p138_p2 = pnand %p724_p0, %p137_p1 }
   0x5   : > { %p160_p3 = scmp.lt.s32.totalorder (!%p138_p2), %s720_s13, 1  ;;  %v855_v0 = vmov (!%p138_p2), 0.0   ;;  %vm856_vm0 = vmmov (!%p138_p2), 0   ;;  %s857_s18 = smov (!%p138_p2), 126   ;;  %vm192_vm1 = vcmask (!%p138_p2), 130048   ;;  %v865_v5 = vmov (!%p138_p2), 0  }
   0x6   : > { %141 = sbr.rel (%p138_p2) target bundleno = 392 (0x188), region = 32  ;;  %769 = vmatprep.subr.bf16.mxu0 (!%p138_p2), %v855_v0  ;;  %775 = vmatprep.subr.bf16.mxu1 (!%p138_p2), %v855_v0  ;;  %s858_s19 = smov (!%p138_p2), 127   ;;  %v170_v4 = vld [vmem:[%s973_s0] sm:$0xf] (!%p138_p2)  ;;  %vm189_vm2 = vcmask (!%p138_p2), 1039360   ;;  %vm291_vm3 = vcmask (!%p138_p2), 1031168  }
   0x7   : > { %771 = vmatprep.mubr.msk.bf16.mxu0 (!%p138_p2), %vm856_vm0, %v855_v0  ;;  %777 = vmatprep.mubr.msk.bf16.mxu1 (!%p138_p2), %vm856_vm0, %v855_v0  ;;  %s859_s22 = smov (!%p138_p2), 118   ;;  %s860_s23 = smov (!%p138_p2), 117   ;;  %v656_v6 = vld [vmem:[%s974_s1] sm:$0xff] (!%p138_p2)  ;;  %vm344_vm4 = vcmask (!%p138_p2), 965632   ;;  %v736_v17 = vld [vmem:[%s973_s0 + $0xc] sm:$0xf] (!%p138_p2) }
   0x8   : > { %s861_s24 = smov (!%p138_p2), 116   ;;  %s862_s25 = smov (!%p138_p2), 108   ;;  %842 = vset.pattern.permute.xlu0 (!%p138_p2), %v865_v5  ;;  %v728_v12 = vld [vmem:[%s973_s0 + $0x4] sm:$0xf] (!%p138_p2)  ;;  %vm397_vm5 = vcmask (!%p138_p2), 957440   ;;  %vm450_vm6 = vcmask (!%p138_p2), 949248  }
   0x9   : > { %s863_s26 = smov (!%p138_p2), 107   ;;  %s864_s27 = smov (!%p138_p2), 106   ;;  %v734_v20 = vld [vmem:[%s973_s0 + $0x8] sm:$0xf] (!%p138_p2)  ;;  %v740_v25 = vld [vmem:[%s973_s0 + $0x14] sm:$0xf] (!%p138_p2) }
   0xa   : > { %vm503_vm7 = vcmask (!%p138_p2), 883712   ;;  %v738_v28 = vld [vmem:[%s973_s0 + $0x10] sm:$0xf] (!%p138_p2)  ;;  %vm556_vm8 = vcmask (!%p138_p2), 875520   ;;  %v744_v33 = vld [vmem:[%s973_s0 + $0x1c] sm:$0xf] (!%p138_p2) }
   0xb   : > { %vm609_vm9 = vcmask (!%p138_p2), 867328   ;;  %v742_v36 = vld [vmem:[%s973_s0 + $0x18] sm:$0xf] (!%p138_p2)  ;;  %v746_v38 = vld [vmem:[%s973_s0 + $0x20] sm:$0xf] (!%p138_p2) }
   0xd   : > { %s978_s13 = smov (!%p160_p3, %s720_s13), 1 }
   0xe   : > { %s750_s14 = sshll.u32 %s978_s13, 4  ;;  %s727_s21 = sshll.u32 %s978_s13, 3 }
   0xf   : > { %s164_s17 = scalar_lea.vmem %s975_s2, %s750_s14 }
  0x10   : > { %v843_v1 = vld [vmem:[%s164_s17] ss:$8 sps:$4 sm:$0xff]   ;;  %v845_v2 = vld [vmem:[%s164_s17 + $0x4] ss:$8 sps:$4 sm:$0xff]  }
  0x11   : > { %287 = vrot.lane.b32.xlu1 %v843_v1, %s857_s18  ;;  %185 = vrot.lane.b32.xlu0 %v843_v1, %s858_s19  ;;  %v846_v3 = vld [vmem:[%s164_s17] ss:$8 sps:$4 sm:$0xff]  }
  0x12   : > { %776 = vmatpush3.bf16.msra.mxu1 %v846_v3 }
  0x13   : > { %787 = vmatprep.subr.bf16.mxu1 %v855_v0 }
  0x15   : > { %289 = vrot.lane.b32.xlu1 %v845_v2, %s857_s18  ;;  %187 = vrot.lane.b32.xlu0 %v845_v2, %s858_s19 }
  0x16   : > { %778 = vmatmul.mubr.msk.bf16.vlgmr.msra.gmra.mrb[0].mxu1 %vm192_vm1, %v170_v4 }
  0x17   : > { %789 = vmatprep.mubr.msk.bf16.mxu1 %vm856_vm0, %v855_v0 }
  0x19   : > { %342 = vrot.lane.b32.xlu1 %v845_v2, %s859_s22  ;;  %340 = vrot.lane.b32.xlu0 %v843_v1, %s859_s22 }
  0x1d   : > { %395 = vrot.lane.b32.xlu1 %v845_v2, %s860_s23  ;;  %393 = vrot.lane.b32.xlu0 %v843_v1, %s860_s23 }
  0x21   : > { %448 = vrot.lane.b32.xlu1 %v845_v2, %s861_s24  ;;  %446 = vrot.lane.b32.xlu0 %v843_v1, %s861_s24  ;;  %s168_s24 = scalar_lea.vmem %s976_s3, %s727_s21 }
  0x25   : > { %501 = vrot.lane.b32.xlu1 %v845_v2, %s862_s25  ;;  %499 = vrot.lane.b32.xlu0 %v843_v1, %s862_s25 }
  0x29   : > { %554 = vrot.lane.b32.xlu1 %v845_v2, %s863_s26  ;;  %552 = vrot.lane.b32.xlu0 %v843_v1, %s863_s26 }
  0x2d   : > { %607 = vrot.lane.b32.xlu1 %v845_v2, %s864_s27  ;;  %605 = vrot.lane.b32.xlu0 %v843_v1, %s864_s27 }
  0x31   : > { %659 = vperm.xlu0 %842, %v656_v6  }
  0x83   : > { %v288_v7 = vpop.permute.xlu1 %287  ;;  %v186_v8 = vpop.permute.xlu0 %185 }
  0x87   : > { %v290_v9 = vpop.permute.xlu1 %289  ;;  %v188_v10 = vpop.permute.xlu0 %187 }
  0x88   : > { %v190_v11 = vsel %vm189_vm2, %v186_v8, %v188_v10  ;;  %v292_v13 = vsel %vm291_vm3, %v288_v7, %v290_v9 }
  0x89   : > { %770 = vmatpush3.bf16.msra.mxu0 %v190_v11 }
  0x8a   : > { %781 = vmatprep.subr.bf16.mxu0 %v855_v0 }
  0x8b   : > { %v343_v14 = vpop.permute.xlu1 %342  ;;  %v341_v15 = vpop.permute.xlu0 %340 }
  0x8c   : > { %772 = vmatmul.mubr.msk.bf16.vlgmr.msra.gmra.mrb[0].mxu0 %vm192_vm1, %v728_v12  ;;  %v345_v16 = vsel %vm344_vm4, %v341_v15, %v343_v14 }
  0x8d   : > { %782 = vmatpush3.bf16.msra.mxu0 %v292_v13  ;;  %788 = vmatpush3.bf16.msra.mxu1 %v345_v16 }
  0x8e   : > { %783 = vmatprep.mubr.msk.bf16.mxu0 %vm856_vm0, %v855_v0  ;;  %793 = vmatprep.subr.bf16.mxu0 %v855_v0 }
  0x8f   : > { %v396_v18 = vpop.permute.xlu1 %395  ;;  %v394_v19 = vpop.permute.xlu0 %393  ;;  %799 = vmatprep.subr.bf16.mxu1 %v855_v0 }
  0x90   : > { %790 = vmatmul.mubr.msk.bf16.vlgmr.msra.gmra.mrb[4].mxu1 %vm192_vm1, %v736_v17  ;;  %v398_v21 = vsel %vm397_vm5, %v394_v19, %v396_v18 }
  0x91   : > { %801 = vmatprep.mubr.msk.bf16.mxu1 %vm856_vm0, %v855_v0 }
  0x93   : > { %v449_v22 = vpop.permute.xlu1 %448  ;;  %v447_v23 = vpop.permute.xlu0 %446 }
  0x94   : > { %784 = vmatmul.mubr.msk.bf16.vlgmr.msra.gmra.mrb[4].mxu0 %vm192_vm1, %v734_v20  ;;  %v451_v24 = vsel %vm450_vm6, %v447_v23, %v449_v22 }
  0x95   : > { %794 = vmatpush3.bf16.msra.mxu0 %v398_v21  ;;  %800 = vmatpush3.bf16.msra.mxu1 %v451_v24 }
  0x96   : > { %795 = vmatprep.mubr.msk.bf16.mxu0 %vm856_vm0, %v855_v0  ;;  %805 = vmatprep.subr.bf16.mxu0 %v855_v0 }
  0x97   : > { %v502_v26 = vpop.permute.xlu1 %501  ;;  %v500_v27 = vpop.permute.xlu0 %499  ;;  %811 = vmatprep.subr.bf16.mxu1 %v855_v0 }
  0x98   : > { %802 = vmatmul.mubr.msk.bf16.vlgmr.msra.gmra.mrb[8].mxu1 %vm192_vm1, %v740_v25  ;;  %v504_v29 = vsel %vm503_vm7, %v500_v27, %v502_v26 }
  0x99   : > { %813 = vmatprep.mubr.msk.bf16.mxu1 %vm856_vm0, %v855_v0 }
  0x9b   : > { %v555_v30 = vpop.permute.xlu1 %554  ;;  %v553_v31 = vpop.permute.xlu0 %552 }
  0x9c   : > { %796 = vmatmul.mubr.msk.bf16.vlgmr.msra.gmra.mrb[8].mxu0 %vm192_vm1, %v738_v28  ;;  %v557_v32 = vsel %vm556_vm8, %v553_v31, %v555_v30 }
  0x9d   : > { %806 = vmatpush3.bf16.msra.mxu0 %v504_v29  ;;  %812 = vmatpush3.bf16.msra.mxu1 %v557_v32 }
  0x9e   : > { %807 = vmatprep.mubr.msk.bf16.mxu0 %vm856_vm0, %v855_v0  ;;  %817 = vmatprep.subr.bf16.mxu0 %v855_v0 }
  0x9f   : > { %v608_v34 = vpop.permute.xlu1 %607  ;;  %v606_v35 = vpop.permute.xlu0 %605 }
  0xa0   : > { %814 = vmatmul.mubr.msk.bf16.vlgmr.msra.gmra.mrb[12].mxu1 %vm192_vm1, %v744_v33  ;;  %v610_v37 = vsel %vm609_vm9, %v606_v35, %v608_v34 }
  0xa4   : > { %808 = vmatmul.mubr.msk.bf16.vlgmr.msra.gmra.mrb[12].mxu0 %vm192_vm1, %v742_v36 }
  0xa5   : > { %818 = vmatpush3.bf16.msra.mxu0 %v610_v37  ;;  %819 = vmatprep.mubr.msk.bf16.mxu0 %vm856_vm0, %v855_v0 }
  0xac   : > { %820 = vmatmul.mubr.msk.bf16.vlgmr.msra.gmra.mrb[16].mxu0 %vm192_vm1, %v746_v38 }
  0xb0   : > { %v660_v15 = vpop.permute.xlu0 %659 }
  0xe9   : > { %v279_v39 = vpop.f32.mrb[0].mxu1 }
  0xea   : > { %v779_v40 = vpop.f32.mrb[1].mxu1 }
  0xeb   : > { %v282_v41 = vpop.f32.mrb[2].mxu1 }
  0xec   : > { %v780_v42 = vpop.f32.mrb[3].mxu1 }
 0x15f   : > { %v230_v43 = vpop.f32.mrb[0].mxu0 }
 0x160   : > { %v773_v44 = vpop.f32.mrb[1].mxu0  ;;  %v280_v45 = vadd.f32 %v279_v39, %v230_v43 }
 0x161   : > { %v233_v46 = vpop.f32.mrb[2].mxu0 }
 0x162   : > { %v774_v47 = vpop.f32.mrb[3].mxu0 }
 0x163   : > { %v384_v48 = vpop.f32.mrb[4].mxu1 }
 0x164   : > { %v791_v49 = vpop.f32.mrb[5].mxu1 }
 0x165   : > { %v387_v50 = vpop.f32.mrb[6].mxu1 }
 0x166   : > { %v792_v51 = vpop.f32.mrb[7].mxu1 }
 0x167   : > { %v331_v52 = vpop.f32.mrb[4].mxu0 }
 0x168   : > { %v337_v53 = vadd.f32 %v331_v52, %v280_v45  ;;  %v785_v54 = vpop.f32.mrb[5].mxu0 }
 0x169   : > { %v334_v55 = vpop.f32.mrb[6].mxu0 }
 0x16a   : > { %v390_v56 = vadd.f32 %v384_v48, %v337_v53  ;;  %v786_v57 = vpop.f32.mrb[7].mxu0 }
 0x16b   : > { %v490_v58 = vpop.f32.mrb[8].mxu1 }
 0x16c   : > { %v803_v59 = vpop.f32.mrb[9].mxu1 }
 0x16d   : > { %v493_v60 = vpop.f32.mrb[10].mxu1 }
 0x16e   : > { %v804_v61 = vpop.f32.mrb[11].mxu1 }
 0x16f   : > { %v437_v62 = vpop.f32.mrb[8].mxu0 }
 0x170   : > { %v443_v63 = vadd.f32 %v437_v62, %v390_v56  ;;  %v797_v0 = vpop.f32.mrb[9].mxu0 }
 0x171   : > { %v440_v1 = vpop.f32.mrb[10].mxu0 }
 0x172   : > { %v496_v2 = vadd.f32 %v490_v58, %v443_v63  ;;  %v798_v3 = vpop.f32.mrb[11].mxu0 }
 0x173   : > { %v596_v4 = vpop.f32.mrb[12].mxu1 }
 0x174   : > { %v815_v5 = vpop.f32.mrb[13].mxu1 }
 0x175   : > { %v599_v6 = vpop.f32.mrb[14].mxu1 }
 0x176   : > { %v816_v7 = vpop.f32.mrb[15].mxu1 }
 0x177   : > { %v543_v8 = vpop.f32.mrb[12].mxu0 }
 0x178   : > { %v549_v9 = vadd.f32 %v543_v8, %v496_v2  ;;  %v809_v10 = vpop.f32.mrb[13].mxu0 }
 0x179   : > { %v546_v11 = vpop.f32.mrb[14].mxu0 }
 0x17a   : > { %v602_v12 = vadd.f32 %v596_v4, %v549_v9  ;;  %v810_v13 = vpop.f32.mrb[15].mxu0 }
 0x17f   : > { %v649_v14 = vpop.f32.mrb[16].mxu0 }
 0x180   : > { %v655_v16 = vadd.f32 %v649_v14, %v602_v12  ;;  %v821_v17 = vpop.f32.mrb[17].mxu0 }
 0x181   : > { %v652_v18 = vpop.f32.mrb[18].mxu0 }
 0x182   : > { %v662_v19 = vadd.f32 %v660_v15, %v655_v16  ;;  %v822_v20 = vpop.f32.mrb[19].mxu0 }
 0x184   : > { %vm663_vm10 = vcmp.ge.f32.partialorder %v662_v19, 0.0  ;;  %v664_v21 = vmul.f32 0.2, %v662_v19 }
 0x186   : > { %v665_v22 = vsel %vm663_vm10, %v662_v19, %v664_v21 }
 0x187   : > { %666 = vst [vmem:[%s168_s24] sm:$0xff] %v665_v22 }
 0x188 PF: > { %s13_s12 = sadd.s32 1, %s853_s12  }
 0x189   : > { %p10_p4 = scmp.ge.s32.totalorder %s13_s12, 4  }
 0x18b   :  { %12 = sbr.rel (!%p10_p4) target bundleno = 1 (0x1), region = 70 }

</bundles_post_ra>
